<compile_context>
chip_gen: v6e
topology: v6e:2x2x1
jax: 0.10.0
libtpu: 0.0.40
codegen_flags: <defaults>
</compile_context>

<pallas_src>
import functools
from types import SimpleNamespace

import jax
import jax.numpy as jnp
from jax.experimental import pallas as pl
from jax.experimental.pallas import tpu as pltpu


LANES = 128
TRIPLET = {"triplet_retrieval"}

# Encoder-layer parameter keys in kernel argument order (all 2-D arrays).
_ENC_KEYS = ("wqkv", "bqkv", "wo", "bo", "ln1_g", "ln1_b",
             "w1", "b1", "w2", "b2", "ln2_g", "ln2_b")


# ----------------------------------------------------------------------------
# small helpers
# ----------------------------------------------------------------------------

def _pad_to_lanes(n):
    return ((n + LANES - 1) // LANES) * LANES


@functools.lru_cache(maxsize=1)
def _vmem_capacity():
    """Physical VMEM bytes; conservative 64 MiB fallback (v7x-sized)."""
    try:
        return int(pltpu.get_tpu_info().vmem_capacity_bytes)
    except Exception:  # noqa: BLE001 - any failure -> conservative default
        return 64 * 1024 * 1024


def _pick_batch_tile(batch, seq):
    """Largest batch tile whose bt*seq rows fit a generation-aware row budget,
    while keeping the grid >= 2 steps when batch > 1 (v7x megacore)."""
    max_rows = 1024 if _vmem_capacity() > 64 * 1024 * 1024 else 512
    cap = batch if batch == 1 else max(1, batch // 2)
    best = 1
    for d in range(1, cap + 1):
        if batch % d == 0 and d * seq <= max_rows:
            best = d
    return best


def _pick_row_tile(m):
    for tm in (512, 256, 128):
        if m % tm == 0:
            return tm
    return m


def _ffn_chunk(f_dim):
    """Chunk width for the FFN inner dimension (bounds the f32 intermediate)."""
    if f_dim <= 1024:
        return f_dim
    for c in (1024, 768, 512, 384, 256, 128):
        if f_dim % c == 0:
            return c
    return f_dim


def _cparams():
    cap = _vmem_capacity()
    # ~56 MiB on v7x (64 MiB physical), ~100 MiB on v5e/v6e (128 MiB physical).
    limit = min(100 * 1024 * 1024, max(cap - 8 * 1024 * 1024, cap // 2))
    return pltpu.CompilerParams(dimension_semantics=("parallel",),
                                vmem_limit_bytes=limit)


def _layer_norm(x, gamma, beta, eps=1e-12):
    mu = jnp.mean(x, axis=-1, keepdims=True)
    var = jnp.mean((x - mu) ** 2, axis=-1, keepdims=True)
    return (x - mu) * jax.lax.rsqrt(var + eps) * gamma + beta


# ----------------------------------------------------------------------------
# Pallas kernels
# ----------------------------------------------------------------------------

def _encoder_body(x_ref, ab_ref, wqkv_ref, bqkv_ref, wo_ref, bo_ref,
                  g1_ref, be1_ref, w1_ref, b1_ref, w2_ref, b2_ref,
                  g2_ref, be2_ref):
    """One transformer encoder layer on a (bt, S, H) bf16 activation block.

    All matmuls run in bf16 on the MXU with f32 accumulation; softmax/layernorm
    stay in f32.  The 1/sqrt(H) scale is pre-folded into the q block of wqkv.
    Returns the (bt*S, H) f32 hidden states.
    """
    bt, S, H = x_ref.shape
    Hp = wo_ref.shape[0]                       # lane-padded per-projection width
    M = bt * S
    xf = x_ref[...].reshape(M, H)              # bf16, matmul M dimension = bt*S

    # Fused QKV projection: one pass of the LHS through the MXU.
    qkv = jnp.dot(xf, wqkv_ref[...], preferred_element_type=jnp.float32) + bqkv_ref[...]
    # Cast to bf16 immediately (no f32 q/k/v kept live); padding columns are zero.
    q3 = qkv[:, 0 * Hp:1 * Hp].astype(jnp.bfloat16).reshape(bt, S, Hp)
    k3 = qkv[:, 1 * Hp:2 * Hp].astype(jnp.bfloat16).reshape(bt, S, Hp)
    v3 = qkv[:, 2 * Hp:3 * Hp].astype(jnp.bfloat16).reshape(bt, S, Hp)

    # TODO(synk): flash-style key-axis tiling (running max/sum) is required before
    # running with S >~ 1k; the (bt, S, S) f32 score matrix is materialized here.
    scores = jnp.einsum("bqd,bkd->bqk", q3, k3,
                        preferred_element_type=jnp.float32) + ab_ref[...]
    m = jnp.max(scores, axis=-1, keepdims=True)
    e = jnp.exp(scores - m)
    probs = e * pl.reciprocal(jnp.sum(e, axis=-1, keepdims=True), approx=True)
    ctx = jnp.einsum("bqk,bkd->bqd", probs.astype(jnp.bfloat16), v3,
                     preferred_element_type=jnp.float32)
    ctx = ctx.reshape(M, Hp).astype(jnp.bfloat16)

    attn = jnp.dot(ctx, wo_ref[...], preferred_element_type=jnp.float32) + bo_ref[...]
    h = _layer_norm(xf.astype(jnp.float32) + attn, g1_ref[...], be1_ref[...])

    # FFN, chunked over F so the f32 intermediate stays bounded; bf16 matmuls.
    F = w1_ref.shape[1]
    chunk = _ffn_chunk(F)
    h_bf = h.astype(jnp.bfloat16)
    f = jnp.zeros((M, H), jnp.float32)
    for c0 in range(0, F, chunk):
        # TODO(synk): PyTorch nn.GELU defaults to the exact erf form; tanh approx here.
        u = jax.nn.gelu(
            jnp.dot(h_bf, w1_ref[:, c0:c0 + chunk],
                    preferred_element_type=jnp.float32) + b1_ref[:, c0:c0 + chunk],
            approximate=True)
        f = f + jnp.dot(u.astype(jnp.bfloat16), w2_ref[c0:c0 + chunk, :],
                        preferred_element_type=jnp.float32)
    f = f + b2_ref[...]
    return _layer_norm(h + f, g2_ref[...], be2_ref[...])          # (bt*S, H) f32


def encoder_head_kernel(x_ref, ab_ref, wqkv_ref, bqkv_ref, wo_ref, bo_ref,
                        g1_ref, be1_ref, w1_ref, b1_ref, w2_ref, b2_ref,
                        g2_ref, be2_ref, hw_ref, hb_ref, head_ref):
    # Fused encoder layer + per-token task-head projection (lane-dense output).
    bt, S, H = x_ref.shape
    out = _encoder_body(x_ref, ab_ref, wqkv_ref, bqkv_ref, wo_ref, bo_ref,
                        g1_ref, be1_ref, w1_ref, b1_ref, w2_ref, b2_ref,
                        g2_ref, be2_ref)
    head = jnp.dot(out.astype(jnp.bfloat16), hw_ref[...],
                   preferred_element_type=jnp.float32) + hb_ref[...]
    head_ref[...] = head.reshape(bt, S, hw_ref.shape[1]).astype(head_ref.dtype)


def encoder_pooled_head_kernel(x_ref, ab_ref, wqkv_ref, bqkv_ref, wo_ref, bo_ref,
                               g1_ref, be1_ref, w1_ref, b1_ref, w2_ref, b2_ref,
                               g2_ref, be2_ref, hw_ref, hb_ref, head_ref):
    # Fused encoder layer + pooled (token 0 only) task-head projection.
    # Saves S x head FLOPs and S x output writeback vs. the per-token variant.
    bt, S, H = x_ref.shape
    out = _encoder_body(x_ref, ab_ref, wqkv_ref, bqkv_ref, wo_ref, bo_ref,
                        g1_ref, be1_ref, w1_ref, b1_ref, w2_ref, b2_ref,
                        g2_ref, be2_ref)
    pooled = out.reshape(bt, S, H)[:, 0, :]                        # (bt, H) f32
    head = jnp.dot(pooled.astype(jnp.bfloat16), hw_ref[...],
                   preferred_element_type=jnp.float32) + hb_ref[...]
    head_ref[...] = head.reshape(bt, 1, hw_ref.shape[1]).astype(head_ref.dtype)


def encoder_feat_kernel(x_ref, ab_ref, wqkv_ref, bqkv_ref, wo_ref, bo_ref,
                        g1_ref, be1_ref, w1_ref, b1_ref, w2_ref, b2_ref,
                        g2_ref, be2_ref, feat_ref):
    # Encoder layer only (standalone `encoding`); bf16 writeback (consumer is a
    # bf16 head matmul) to halve the output DMA.
    bt, S, H = x_ref.shape
    out = _encoder_body(x_ref, ab_ref, wqkv_ref, bqkv_ref, wo_ref, bo_ref,
                        g1_ref, be1_ref, w1_ref, b1_ref, w2_ref, b2_ref,
                        g2_ref, be2_ref)
    feat_ref[...] = out.reshape(bt, S, H).astype(feat_ref.dtype)


def dense_kernel(x_ref, w_ref, b_ref, o_ref):
    o_ref[...] = (jnp.dot(x_ref[...], w_ref[...],
                          preferred_element_type=jnp.float32)
                  + b_ref[...]).astype(o_ref.dtype)


def triplet_loss_kernel(a_ref, p_ref, n_ref, t_ref, o_ref, *, margin):
    # PairwiseDistance(p=1, eps=1e-6):  sum(|x1 - x2 + eps|) along the last dim.
    # MarginRankingLoss(margin):        mean(max(0, -y*(d_pos - d_neg) + margin))
    a = a_ref[...].astype(jnp.float32)
    p = p_ref[...].astype(jnp.float32)
    n = n_ref[...].astype(jnp.float32)
    t = t_ref[...].astype(jnp.float32)                            # (B, 1)
    eps = 1e-6
    pos = jnp.sum(jnp.abs(a - p + eps), axis=-1, keepdims=True)   # (B, 1)
    neg = jnp.sum(jnp.abs(a - n + eps), axis=-1, keepdims=True)   # (B, 1)
    per = jnp.maximum(0.0, -t * (pos - neg) + margin)             # (B, 1)
    o_ref[...] = jnp.mean(per, axis=0, keepdims=True)             # (1, 1)


# ----------------------------------------------------------------------------
# pallas_call wrappers
# ----------------------------------------------------------------------------

def _const_spec(shape):
    # Constant-index 2-D weight block: single-buffered (no double-buffer VMEM cost,
    # Pallas skips re-DMA across grid steps anyway since the index_map is constant).
    return pl.BlockSpec(shape, lambda b: (0, 0), pipeline_mode=pl.Buffered(1))


def _enc_weight_specs(p):
    return [_const_spec(p[k].shape) for k in _ENC_KEYS]


def encoder_with_head(x, attn_bias, p, head_w, head_b):
    """Fused encoder layer + per-token head.  x: (B, S, H) bf16 -> (B, S, Npad) f32."""
    B, S, H = x.shape
    N = head_w.shape[1]
    bt = _pick_batch_tile(B, S)
    return pl.pallas_call(
        encoder_head_kernel,
        out_shape=jax.ShapeDtypeStruct((B, S, N), jnp.float32),
        grid=(B // bt,),
        in_specs=[pl.BlockSpec((bt, S, H), lambda b: (b, 0, 0)),      # activations
                  pl.BlockSpec((bt, 1, S), lambda b: (b, 0, 0))]      # additive attn bias
                 + _enc_weight_specs(p)
                 + [_const_spec(head_w.shape), _const_spec(head_b.shape)],
        out_specs=pl.BlockSpec((bt, S, N), lambda b: (b, 0, 0)),      # lane-dense store
        compiler_params=_cparams(),
    )(x, attn_bias, *[p[k] for k in _ENC_KEYS], head_w, head_b)


def encoder_with_pooled_head(x, attn_bias, p, head_w, head_b):
    """Fused encoder layer + pooled (token 0) head.  x: (B,S,H) bf16 -> (B, Npad) f32."""
    B, S, H = x.shape
    N = head_w.shape[1]
    bt = _pick_batch_tile(B, S)
    out = pl.pallas_call(
        encoder_pooled_head_kernel,
        out_shape=jax.ShapeDtypeStruct((B, 1, N), jnp.float32),
        grid=(B // bt,),
        in_specs=[pl.BlockSpec((bt, S, H), lambda b: (b, 0, 0)),
                  pl.BlockSpec((bt, 1, S), lambda b: (b, 0, 0))]
                 + _enc_weight_specs(p)
                 + [_const_spec(head_w.shape), _const_spec(head_b.shape)],
        out_specs=pl.BlockSpec((bt, 1, N), lambda b: (b, 0, 0)),
        compiler_params=_cparams(),
    )(x, attn_bias, *[p[k] for k in _ENC_KEYS], head_w, head_b)
    return out[:, 0, :]


def encoder_features(x, attn_bias, p):
    """Encoder layer only (standalone `encoding`).  x: (B,S,H) bf16 -> (B,S,H) bf16."""
    B, S, H = x.shape
    bt = _pick_batch_tile(B, S)
    return pl.pallas_call(
        encoder_feat_kernel,
        out_shape=jax.ShapeDtypeStruct((B, S, H), jnp.bfloat16),
        grid=(B // bt,),
        in_specs=[pl.BlockSpec((bt, S, H), lambda b: (b, 0, 0)),
                  pl.BlockSpec((bt, 1, S), lambda b: (b, 0, 0))] + _enc_weight_specs(p),
        out_specs=pl.BlockSpec((bt, S, H), lambda b: (b, 0, 0)),
        compiler_params=_cparams(),
    )(x, attn_bias, *[p[k] for k in _ENC_KEYS])


def dense(x, w, b):
    """Row-tiled linear head: (M, K) bf16 @ (K, Npad) bf16 + (1, Npad) -> (M, Npad) f32."""
    M, K = x.shape
    N = w.shape[1]
    tm = _pick_row_tile(M)
    return pl.pallas_call(
        dense_kernel,
        out_shape=jax.ShapeDtypeStruct((M, N), jnp.float32),
        grid=(M // tm,),
        in_specs=[pl.BlockSpec((tm, K), lambda i: (i, 0)),
                  pl.BlockSpec((K, N), lambda i: (0, 0), pipeline_mode=pl.Buffered(1)),
                  pl.BlockSpec((1, N), lambda i: (0, 0), pipeline_mode=pl.Buffered(1))],
        out_specs=pl.BlockSpec((tm, N), lambda i: (i, 0)),
        compiler_params=_cparams(),
    )(x, w, b)


def triplet_margin_loss(a, p, n, target, margin):
    out = pl.pallas_call(
        functools.partial(triplet_loss_kernel, margin=float(margin)),
        out_shape=jax.ShapeDtypeStruct((1, 1), jnp.float32),
    )(a, p, n, target)
    return out[0, 0]


# ----------------------------------------------------------------------------
# Inference module (JAX / Pallas analogue of the PyTorch class)
# ----------------------------------------------------------------------------

class Inference:
    def __init__(self, config, key):
        self.config = config
        H, F = config.hidden, config.ffn
        V, P, T = config.vocab, config.max_pos, config.type_vocab
        C, D = config.num_labels, config.embed_out
        Hp = _pad_to_lanes(H)
        self.h_pad = Hp
        self.cls_pad = _pad_to_lanes(C)
        self.emb_pad = _pad_to_lanes(D)

        ks = list(jax.random.split(key, 16))

        def nrm32(k, shape):
            return 0.02 * jax.random.normal(k, shape, dtype=jnp.float32)

        # Fused QKV weight, lane-padded per projection; 1/sqrt(H) folded into q.
        scale = float(H) ** -0.5
        wq, wk, wv = nrm32(ks[3], (H, H)), nrm32(ks[4], (H, H)), nrm32(ks[5], (H, H))
        wqkv = jnp.zeros((H, 3 * Hp), jnp.float32)
        wqkv = wqkv.at[:, 0:H].set(wq * scale)
        wqkv = wqkv.at[:, Hp:Hp + H].set(wk)
        wqkv = wqkv.at[:, 2 * Hp:2 * Hp + H].set(wv)
        wo = nrm32(ks[6], (H, H))
        wo_pad = jnp.zeros((Hp, H), jnp.float32).at[:H, :].set(wo)

        cls_w = nrm32(ks[9], (H, C))
        emb_w = nrm32(ks[10], (H, D))
        cls_w_pad = jnp.zeros((H, self.cls_pad), jnp.float32).at[:, :C].set(cls_w)
        emb_w_pad = jnp.zeros((H, self.emb_pad), jnp.float32).at[:, :D].set(emb_w)

        self.params = {
            # embeddings (gather stays in plain JAX glue)
            "tok_emb": nrm32(ks[0], (V, H)),
            "pos_emb": nrm32(ks[1], (P, H)),
            "seg_emb": nrm32(ks[2], (T, H)),
            # encoder layer: matmul weights bf16, biases / layernorm params f32
            "wqkv": wqkv.astype(jnp.bfloat16),
            "bqkv": jnp.zeros((1, 3 * Hp), jnp.float32),   # bq (scaled) | bk | bv, zero init
            "wo": wo_pad.astype(jnp.bfloat16),
            "bo": jnp.zeros((1, H), jnp.float32),
            "ln1_g": jnp.ones((1, H), jnp.float32),
            "ln1_b": jnp.zeros((1, H), jnp.float32),
            "w1": nrm32(ks[7], (H, F)).astype(jnp.bfloat16),
            "b1": jnp.zeros((1, F), jnp.float32),
            "w2": nrm32(ks[8], (F, H)).astype(jnp.bfloat16),
            "b2": jnp.zeros((1, H), jnp.float32),
            "ln2_g": jnp.ones((1, H), jnp.float32),
            "ln2_b": jnp.zeros((1, H), jnp.float32),
            # task heads, lane-padded to a multiple of 128 (padding sliced off in JAX)
            "cls_w_pad": cls_w_pad.astype(jnp.bfloat16),
            "cls_b_pad": jnp.zeros((1, self.cls_pad), jnp.float32),
            "emb_w_pad": emb_w_pad.astype(jnp.bfloat16),
            "emb_b_pad": jnp.zeros((1, self.emb_pad), jnp.float32),
        }

    # ---- glue: embedding lookup + additive attention bias --------------------
    def _embed(self, input_ids, input_mask, segment_ids):
        p = self.params
        B, S = input_ids.shape
        emb = (jnp.take(p["tok_emb"], input_ids, axis=0)
               + p["pos_emb"][None, :S, :]
               + jnp.take(p["seg_emb"], segment_ids, axis=0))
        attn_bias = ((1.0 - input_mask.astype(jnp.float32)) * -1e9)[:, None, :]  # (B,1,S)
        return emb.astype(jnp.bfloat16), attn_bias

    # ---- encoding: Pallas transformer layer (features only) ------------------
    def encoding(self, input_ids, input_mask, segment_ids):
        emb, bias = self._embed(input_ids, input_mask, segment_ids)
        return {"features": encoder_features(emb, bias, self.params)}

    # ---- decoding: standalone per-task linear heads (tiled, lane-dense) ------
    def decoding(self, task_name, features):
        p = self.params
        if task_name in TRIPLET:
            pooled = features[:, 0, :].astype(jnp.bfloat16)                   # (B, H)
            return dense(pooled, p["emb_w_pad"], p["emb_b_pad"])[:, :self.config.embed_out]
        B, S, H = features.shape
        flat = features.reshape(B * S, H).astype(jnp.bfloat16)
        logits = dense(flat, p["cls_w_pad"], p["cls_b_pad"])[:, :self.config.num_labels]
        return logits.reshape(B, S, -1)

    # ---- forward dispatch (default + triplet paths), heads fused in-kernel ----
    def forward(self, task_name, **kwargs):
        if task_name in TRIPLET:
            return {task_name: self.triplet_forward(task_name=task_name, **kwargs)}
        # TODO(synk): PARALLEL_TEACHER_STUDENT / SIAMESE / MIXSENT paths need external
        # teacher predictions / task-specific modules and are not reproduced here.
        p = self.params
        emb, bias = self._embed(kwargs["input_ids"], kwargs["input_mask"],
                                kwargs["segment_ids"])
        head = encoder_with_head(emb, bias, p, p["cls_w_pad"], p["cls_b_pad"])
        logits = head[:, :, :self.config.num_labels]
        return {task_name: {"logits": logits}}

    def triplet_forward(self, task_name, input_ids, input_mask, segment_ids,
                        p_input_ids=None, p_input_mask=None, p_segment_ids=None,
                        n_input_ids=None, n_input_mask=None, n_segment_ids=None,
                        extra_args=None, is_inference=False):
        p = self.params
        D = self.config.embed_out
        if is_inference:
            emb, bias = self._embed(input_ids, input_mask, segment_ids)
            pooled = encoder_with_pooled_head(emb, bias, p, p["emb_w_pad"], p["emb_b_pad"])
            return {"logits": pooled[:, :D]}

        # Fuse anchor / positive / negative into one pooled encoder+head call (grid over 3B).
        B = input_ids.shape[0]
        ids = jnp.concatenate([input_ids, p_input_ids, n_input_ids], axis=0)
        mask = jnp.concatenate([input_mask, p_input_mask, n_input_mask], axis=0)
        segs = jnp.concatenate([segment_ids, p_segment_ids, n_segment_ids], axis=0)
        emb, bias = self._embed(ids, mask, segs)
        pooled = encoder_with_pooled_head(emb, bias, p, p["emb_w_pad"], p["emb_b_pad"])
        logits_all = pooled[:, :D]                                    # (3B, D)
        a_logits = logits_all[:B]
        p_logits = logits_all[B:2 * B]
        n_logits = logits_all[2 * B:]
        loss = triplet_margin_loss(a_logits, p_logits, n_logits,
                                   extra_args["target"],
                                   margin=self.config.max_margin)
        return {"loss": loss}


# ----------------------------------------------------------------------------
# main
# ----------------------------------------------------------------------------

if __name__ == "__main__":
    config = SimpleNamespace(
        hidden=32, ffn=64, vocab=100, max_pos=32, type_vocab=2,
        num_labels=4, embed_out=32, max_margin=1.0,
    )
    B, S = 2, 8

    key = jax.random.PRNGKey(0)
    k_param, k_a, k_p, k_n = jax.random.split(key, 4)

    inf = Inference(config, k_param)

    def make_batch(k):
        ids = jax.random.randint(k, (B, S), 0, config.vocab, dtype=jnp.int32)
        mask = jnp.ones((B, S), jnp.int32)
        segs = jnp.zeros((B, S), jnp.int32)
        return ids, mask, segs

    a_ids, a_mask, a_seg = make_batch(k_a)
    p_ids, p_mask, p_seg = make_batch(k_p)
    n_ids, n_mask, n_seg = make_batch(k_n)

    # default (token classification) path -> logits (fused encoder + cls head)
    out = inf.forward("sequence_labeling",
                      input_ids=a_ids, input_mask=a_mask, segment_ids=a_seg)
    logits = jax.block_until_ready(out["sequence_labeling"]["logits"])
    assert logits.shape == (B, S, config.num_labels)
    assert bool(jnp.all(jnp.isfinite(logits)))

    # standalone encoding() + decoding() path must agree with the fused kernel
    feats = inf.encoding(a_ids, a_mask, a_seg)["features"]
    logits_ref = jax.block_until_ready(inf.decoding("sequence_labeling", feats))
    assert bool(jnp.allclose(logits_ref, logits, atol=1e-2, rtol=1e-2))

    # triplet path -> PairwiseDistance(p=1) + MarginRankingLoss(margin)
    target = -jnp.ones((B, 1), jnp.float32)
    trip = inf.forward("triplet_retrieval",
                       input_ids=a_ids, input_mask=a_mask, segment_ids=a_seg,
                       p_input_ids=p_ids, p_input_mask=p_mask, p_segment_ids=p_seg,
                       n_input_ids=n_ids, n_input_mask=n_mask, n_segment_ids=n_seg,
                       extra_args={"target": target}, is_inference=False)
    loss = jax.block_until_ready(trip["triplet_retrieval"]["loss"])
    assert loss.shape == () and bool(jnp.isfinite(loss))

    # triplet inference path -> pooled embedding logits
    trip_inf = inf.forward("triplet_retrieval",
                           input_ids=a_ids, input_mask=a_mask, segment_ids=a_seg,
                           extra_args={}, is_inference=True)
    emb_logits = jax.block_until_ready(trip_inf["triplet_retrieval"]["logits"])
    assert emb_logits.shape == (B, config.embed_out)
    assert bool(jnp.all(jnp.isfinite(emb_logits)))

    print("KERNEL_OK")
</pallas_src>

<mosaic_0001>
module attributes {stable_mosaic.version = 11 : i64} {
  func.func @encoder_head_kernel(%arg0: i32, %arg1: memref<1x8x32xbf16, #tpu.memory_space<vmem>>, %arg2: memref<1x1x8xf32, #tpu.memory_space<vmem>>, %arg3: memref<32x384xbf16, #tpu.memory_space<vmem>>, %arg4: memref<1x384xf32, #tpu.memory_space<vmem>>, %arg5: memref<128x32xbf16, #tpu.memory_space<vmem>>, %arg6: memref<1x32xf32, #tpu.memory_space<vmem>>, %arg7: memref<1x32xf32, #tpu.memory_space<vmem>>, %arg8: memref<1x32xf32, #tpu.memory_space<vmem>>, %arg9: memref<32x64xbf16, #tpu.memory_space<vmem>>, %arg10: memref<1x64xf32, #tpu.memory_space<vmem>>, %arg11: memref<64x32xbf16, #tpu.memory_space<vmem>>, %arg12: memref<1x32xf32, #tpu.memory_space<vmem>>, %arg13: memref<1x32xf32, #tpu.memory_space<vmem>>, %arg14: memref<1x32xf32, #tpu.memory_space<vmem>>, %arg15: memref<32x128xbf16, #tpu.memory_space<vmem>>, %arg16: memref<1x128xf32, #tpu.memory_space<vmem>>, %arg17: memref<1x8x128xf32, #tpu.memory_space<vmem>>) attributes {dimension_semantics = [#tpu.dimension_semantics<parallel>], iteration_bounds = array<i64: 2>, scalar_prefetch = 0 : i64, scratch_operands = 0 : i64, tpu.core_type = #tpu.core_type<tc>, window_params = [{transform_indices = @transform_0, window_bounds = array<i64: 1, 8, 32>}, {transform_indices = @transform_1, window_bounds = array<i64: 1, 1, 8>}, {pipeline_mode = #tpu.pipeline_mode<synchronous>, transform_indices = @transform_2, window_bounds = array<i64: 32, 384>}, {pipeline_mode = #tpu.pipeline_mode<synchronous>, transform_indices = @transform_3, window_bounds = array<i64: 1, 384>}, {pipeline_mode = #tpu.pipeline_mode<synchronous>, transform_indices = @transform_4, window_bounds = array<i64: 128, 32>}, {pipeline_mode = #tpu.pipeline_mode<synchronous>, transform_indices = @transform_5, window_bounds = array<i64: 1, 32>}, {pipeline_mode = #tpu.pipeline_mode<synchronous>, transform_indices = @transform_6, window_bounds = array<i64: 1, 32>}, {pipeline_mode = #tpu.pipeline_mode<synchronous>, transform_indices = @transform_7, window_bounds = array<i64: 1, 32>}, {pipeline_mode = #tpu.pipeline_mode<synchronous>, transform_indices = @transform_8, window_bounds = array<i64: 32, 64>}, {pipeline_mode = #tpu.pipeline_mode<synchronous>, transform_indices = @transform_9, window_bounds = array<i64: 1, 64>}, {pipeline_mode = #tpu.pipeline_mode<synchronous>, transform_indices = @transform_10, window_bounds = array<i64: 64, 32>}, {pipeline_mode = #tpu.pipeline_mode<synchronous>, transform_indices = @transform_11, window_bounds = array<i64: 1, 32>}, {pipeline_mode = #tpu.pipeline_mode<synchronous>, transform_indices = @transform_12, window_bounds = array<i64: 1, 32>}, {pipeline_mode = #tpu.pipeline_mode<synchronous>, transform_indices = @transform_13, window_bounds = array<i64: 1, 32>}, {pipeline_mode = #tpu.pipeline_mode<synchronous>, transform_indices = @transform_14, window_bounds = array<i64: 32, 128>}, {pipeline_mode = #tpu.pipeline_mode<synchronous>, transform_indices = @transform_15, window_bounds = array<i64: 1, 128>}, {transform_indices = @transform_16, window_bounds = array<i64: 1, 8, 128>}]} {
    %c0 = arith.constant 0 : index
    %c0_0 = arith.constant 0 : index
    %c0_1 = arith.constant 0 : index
    %0 = vector.load %arg1[%c0, %c0_0, %c0_1] : memref<1x8x32xbf16, #tpu.memory_space<vmem>>, vector<1x8x32xbf16>
    %1 = vector.shape_cast %0 : vector<1x8x32xbf16> to vector<8x32xbf16>
    %c0_2 = arith.constant 0 : index
    %c0_3 = arith.constant 0 : index
    %2 = vector.load %arg3[%c0_2, %c0_3] : memref<32x384xbf16, #tpu.memory_space<vmem>>, vector<32x384xbf16>
    %cst = arith.constant dense<0.000000e+00> : vector<8x384xf32>
    %3 = tpu.matmul %1, %2, %cst {dimension_numbers = #tpu.dot_dimension_numbers<[1], [0], [0], [1], [0, 0, 1, 1], [], []>} : vector<8x32xbf16>, vector<32x384xbf16>, vector<8x384xf32> -> vector<8x384xf32>
    %c0_4 = arith.constant 0 : index
    %c0_5 = arith.constant 0 : index
    %4 = vector.load %arg4[%c0_4, %c0_5] : memref<1x384xf32, #tpu.memory_space<vmem>>, vector<1x384xf32>
    %5 = vector.broadcast %4 : vector<1x384xf32> to vector<8x384xf32>
    %6 = arith.addf %3, %5 : vector<8x384xf32>
    %7 = vector.extract_strided_slice %6 {offsets = [0, 0], sizes = [8, 128], strides = [1, 1]} : vector<8x384xf32> to vector<8x128xf32>
    %8 = arith.truncf %7 : vector<8x128xf32> to vector<8x128xbf16>
    %9 = vector.shape_cast %8 : vector<8x128xbf16> to vector<1x8x128xbf16>
    %10 = vector.extract_strided_slice %6 {offsets = [0, 128], sizes = [8, 128], strides = [1, 1]} : vector<8x384xf32> to vector<8x128xf32>
    %11 = arith.truncf %10 : vector<8x128xf32> to vector<8x128xbf16>
    %12 = vector.shape_cast %11 : vector<8x128xbf16> to vector<1x8x128xbf16>
    %13 = vector.extract_strided_slice %6 {offsets = [0, 256], sizes = [8, 128], strides = [1, 1]} : vector<8x384xf32> to vector<8x128xf32>
    %14 = arith.truncf %13 : vector<8x128xf32> to vector<8x128xbf16>
    %15 = vector.shape_cast %14 : vector<8x128xbf16> to vector<1x8x128xbf16>
    "tpu.trace_start"() <{level = 10 : i32, message = "bqd,bkd->bqk"}> : () -> ()
    %cst_6 = arith.constant dense<0.000000e+00> : vector<1x8x8xf32>
    %16 = tpu.matmul %9, %12, %cst_6 {dimension_numbers = #tpu.dot_dimension_numbers<[2], [2], [1], [1], [0, 0, 0, 1, 1, 1], [0], [0]>} : vector<1x8x128xbf16>, vector<1x8x128xbf16>, vector<1x8x8xf32> -> vector<1x8x8xf32>
    "tpu.trace_stop"() : () -> ()
    %c0_7 = arith.constant 0 : index
    %c0_8 = arith.constant 0 : index
    %c0_9 = arith.constant 0 : index
    %17 = vector.load %arg2[%c0_7, %c0_8, %c0_9] : memref<1x1x8xf32, #tpu.memory_space<vmem>>, vector<1x1x8xf32>
    %18 = vector.broadcast %17 : vector<1x1x8xf32> to vector<1x8x8xf32>
    %19 = arith.addf %16, %18 : vector<1x8x8xf32>
    %cst_10 = arith.constant dense<0xFF800000> : vector<1x8xf32>
    %20 = vector.multi_reduction <maximumf>, %19, %cst_10 [2] : vector<1x8x8xf32> to vector<1x8xf32>
    %21 = vector.shape_cast %20 : vector<1x8xf32> to vector<1x8x1xf32>
    %22 = vector.broadcast %21 : vector<1x8x1xf32> to vector<1x8x8xf32>
    %23 = arith.subf %19, %22 : vector<1x8x8xf32>
    %24 = math.exp %23 : vector<1x8x8xf32>
    %cst_11 = arith.constant dense<0.000000e+00> : vector<1x8xf32>
    %25 = vector.multi_reduction <add>, %24, %cst_11 [2] : vector<1x8x8xf32> to vector<1x8xf32>
    %26 = vector.shape_cast %25 : vector<1x8xf32> to vector<1x8x1xf32>
    %27 = tpu.reciprocal %26 {approx = true} : vector<1x8x1xf32> -> vector<1x8x1xf32>
    %28 = vector.broadcast %27 : vector<1x8x1xf32> to vector<1x8x8xf32>
    %29 = arith.mulf %24, %28 : vector<1x8x8xf32>
    %30 = arith.truncf %29 : vector<1x8x8xf32> to vector<1x8x8xbf16>
    "tpu.trace_start"() <{level = 10 : i32, message = "bqk,bkd->bqd"}> : () -> ()
    %cst_12 = arith.constant dense<0.000000e+00> : vector<1x8x128xf32>
    %31 = tpu.matmul %30, %15, %cst_12 {dimension_numbers = #tpu.dot_dimension_numbers<[2], [1], [1], [2], [0, 0, 0, 1, 1, 2], [0], [0]>} : vector<1x8x8xbf16>, vector<1x8x128xbf16>, vector<1x8x128xf32> -> vector<1x8x128xf32>
    "tpu.trace_stop"() : () -> ()
    %32 = vector.shape_cast %31 : vector<1x8x128xf32> to vector<8x128xf32>
    %33 = arith.truncf %32 : vector<8x128xf32> to vector<8x128xbf16>
    %c0_13 = arith.constant 0 : index
    %c0_14 = arith.constant 0 : index
    %34 = vector.load %arg5[%c0_13, %c0_14] : memref<128x32xbf16, #tpu.memory_space<vmem>>, vector<128x32xbf16>
    %cst_15 = arith.constant dense<0.000000e+00> : vector<8x32xf32>
    %35 = tpu.matmul %33, %34, %cst_15 {dimension_numbers = #tpu.dot_dimension_numbers<[1], [0], [0], [1], [0, 0, 1, 1], [], []>} : vector<8x128xbf16>, vector<128x32xbf16>, vector<8x32xf32> -> vector<8x32xf32>
    %c0_16 = arith.constant 0 : index
    %c0_17 = arith.constant 0 : index
    %36 = vector.load %arg6[%c0_16, %c0_17] : memref<1x32xf32, #tpu.memory_space<vmem>>, vector<1x32xf32>
    %37 = vector.broadcast %36 : vector<1x32xf32> to vector<8x32xf32>
    %38 = arith.addf %35, %37 : vector<8x32xf32>
    %39 = arith.extf %1 : vector<8x32xbf16> to vector<8x32xf32>
    %40 = arith.addf %39, %38 : vector<8x32xf32>
    %c0_18 = arith.constant 0 : index
    %c0_19 = arith.constant 0 : index
    %41 = vector.load %arg7[%c0_18, %c0_19] : memref<1x32xf32, #tpu.memory_space<vmem>>, vector<1x32xf32>
    %c0_20 = arith.constant 0 : index
    %c0_21 = arith.constant 0 : index
    %42 = vector.load %arg8[%c0_20, %c0_21] : memref<1x32xf32, #tpu.memory_space<vmem>>, vector<1x32xf32>
    %cst_22 = arith.constant dense<0.000000e+00> : vector<8xf32>
    %43 = vector.multi_reduction <add>, %40, %cst_22 [1] : vector<8x32xf32> to vector<8xf32>
    %44 = vector.shape_cast %43 : vector<8xf32> to vector<8x1xf32>
    %cst_23 = arith.constant 3.200000e+01 : f32
    %45 = vector.broadcast %cst_23 : f32 to vector<8x1xf32>
    %46 = arith.divf %44, %45 : vector<8x1xf32>
    %47 = vector.broadcast %46 : vector<8x1xf32> to vector<8x32xf32>
    %48 = arith.subf %40, %47 : vector<8x32xf32>
    %49 = arith.mulf %48, %48 : vector<8x32xf32>
    %cst_24 = arith.constant dense<0.000000e+00> : vector<8xf32>
    %50 = vector.multi_reduction <add>, %49, %cst_24 [1] : vector<8x32xf32> to vector<8xf32>
    %51 = vector.shape_cast %50 : vector<8xf32> to vector<8x1xf32>
    %cst_25 = arith.constant 3.200000e+01 : f32
    %52 = vector.broadcast %cst_25 : f32 to vector<8x1xf32>
    %53 = arith.divf %51, %52 : vector<8x1xf32>
    %54 = vector.broadcast %46 : vector<8x1xf32> to vector<8x32xf32>
    %55 = arith.subf %40, %54 : vector<8x32xf32>
    %cst_26 = arith.constant 9.99999996E-13 : f32
    %56 = vector.broadcast %cst_26 : f32 to vector<8x1xf32>
    %57 = arith.addf %53, %56 : vector<8x1xf32>
    %58 = math.rsqrt %57 : vector<8x1xf32>
    %59 = vector.broadcast %58 : vector<8x1xf32> to vector<8x32xf32>
    %60 = arith.mulf %55, %59 : vector<8x32xf32>
    %61 = vector.broadcast %41 : vector<1x32xf32> to vector<8x32xf32>
    %62 = arith.mulf %60, %61 : vector<8x32xf32>
    %63 = vector.broadcast %42 : vector<1x32xf32> to vector<8x32xf32>
    %64 = arith.addf %62, %63 : vector<8x32xf32>
    %65 = arith.truncf %64 : vector<8x32xf32> to vector<8x32xbf16>
    %cst_27 = arith.constant 0.000000e+00 : f32
    %66 = vector.broadcast %cst_27 : f32 to vector<8x32xf32>
    %c0_28 = arith.constant 0 : index
    %c0_29 = arith.constant 0 : index
    %67 = vector.load %arg9[%c0_28, %c0_29] : memref<32x64xbf16, #tpu.memory_space<vmem>>, vector<32x64xbf16>
    %cst_30 = arith.constant dense<0.000000e+00> : vector<8x64xf32>
    %68 = tpu.matmul %65, %67, %cst_30 {dimension_numbers = #tpu.dot_dimension_numbers<[1], [0], [0], [1], [0, 0, 1, 1], [], []>} : vector<8x32xbf16>, vector<32x64xbf16>, vector<8x64xf32> -> vector<8x64xf32>
    %c0_31 = arith.constant 0 : index
    %c0_32 = arith.constant 0 : index
    %69 = vector.load %arg10[%c0_31, %c0_32] : memref<1x64xf32, #tpu.memory_space<vmem>>, vector<1x64xf32>
    %70 = vector.broadcast %69 : vector<1x64xf32> to vector<8x64xf32>
    %71 = arith.addf %68, %70 : vector<8x64xf32>
    %72 = arith.mulf %71, %71 : vector<8x64xf32>
    %73 = arith.mulf %71, %72 : vector<8x64xf32>
    %cst_33 = arith.constant 4.471500e-02 : f32
    %74 = vector.broadcast %cst_33 : f32 to vector<8x64xf32>
    %75 = arith.mulf %74, %73 : vector<8x64xf32>
    %76 = arith.addf %71, %75 : vector<8x64xf32>
    %cst_34 = arith.constant 0.797884583 : f32
    %77 = vector.broadcast %cst_34 : f32 to vector<8x64xf32>
    %78 = arith.mulf %77, %76 : vector<8x64xf32>
    %79 = math.tanh %78 : vector<8x64xf32>
    %cst_35 = arith.constant 1.000000e+00 : f32
    %80 = vector.broadcast %cst_35 : f32 to vector<8x64xf32>
    %81 = arith.addf %80, %79 : vector<8x64xf32>
    %cst_36 = arith.constant 5.000000e-01 : f32
    %82 = vector.broadcast %cst_36 : f32 to vector<8x64xf32>
    %83 = arith.mulf %82, %81 : vector<8x64xf32>
    %84 = arith.mulf %71, %83 : vector<8x64xf32>
    %85 = arith.truncf %84 : vector<8x64xf32> to vector<8x64xbf16>
    %c0_37 = arith.constant 0 : index
    %c0_38 = arith.constant 0 : index
    %86 = vector.load %arg11[%c0_37, %c0_38] : memref<64x32xbf16, #tpu.memory_space<vmem>>, vector<64x32xbf16>
    %cst_39 = arith.constant dense<0.000000e+00> : vector<8x32xf32>
    %87 = tpu.matmul %85, %86, %cst_39 {dimension_numbers = #tpu.dot_dimension_numbers<[1], [0], [0], [1], [0, 0, 1, 1], [], []>} : vector<8x64xbf16>, vector<64x32xbf16>, vector<8x32xf32> -> vector<8x32xf32>
    %88 = arith.addf %66, %87 : vector<8x32xf32>
    %c0_40 = arith.constant 0 : index
    %c0_41 = arith.constant 0 : index
    %89 = vector.load %arg12[%c0_40, %c0_41] : memref<1x32xf32, #tpu.memory_space<vmem>>, vector<1x32xf32>
    %90 = vector.broadcast %89 : vector<1x32xf32> to vector<8x32xf32>
    %91 = arith.addf %88, %90 : vector<8x32xf32>
    %92 = arith.addf %64, %91 : vector<8x32xf32>
    %c0_42 = arith.constant 0 : index
    %c0_43 = arith.constant 0 : index
    %93 = vector.load %arg13[%c0_42, %c0_43] : memref<1x32xf32, #tpu.memory_space<vmem>>, vector<1x32xf32>
    %c0_44 = arith.constant 0 : index
    %c0_45 = arith.constant 0 : index
    %94 = vector.load %arg14[%c0_44, %c0_45] : memref<1x32xf32, #tpu.memory_space<vmem>>, vector<1x32xf32>
    %cst_46 = arith.constant dense<0.000000e+00> : vector<8xf32>
    %95 = vector.multi_reduction <add>, %92, %cst_46 [1] : vector<8x32xf32> to vector<8xf32>
    %96 = vector.shape_cast %95 : vector<8xf32> to vector<8x1xf32>
    %cst_47 = arith.constant 3.200000e+01 : f32
    %97 = vector.broadcast %cst_47 : f32 to vector<8x1xf32>
    %98 = arith.divf %96, %97 : vector<8x1xf32>
    %99 = vector.broadcast %98 : vector<8x1xf32> to vector<8x32xf32>
    %100 = arith.subf %92, %99 : vector<8x32xf32>
    %101 = arith.mulf %100, %100 : vector<8x32xf32>
    %cst_48 = arith.constant dense<0.000000e+00> : vector<8xf32>
    %102 = vector.multi_reduction <add>, %101, %cst_48 [1] : vector<8x32xf32> to vector<8xf32>
    %103 = vector.shape_cast %102 : vector<8xf32> to vector<8x1xf32>
    %cst_49 = arith.constant 3.200000e+01 : f32
    %104 = vector.broadcast %cst_49 : f32 to vector<8x1xf32>
    %105 = arith.divf %103, %104 : vector<8x1xf32>
    %106 = vector.broadcast %98 : vector<8x1xf32> to vector<8x32xf32>
    %107 = arith.subf %92, %106 : vector<8x32xf32>
    %cst_50 = arith.constant 9.99999996E-13 : f32
    %108 = vector.broadcast %cst_50 : f32 to vector<8x1xf32>
    %109 = arith.addf %105, %108 : vector<8x1xf32>
    %110 = math.rsqrt %109 : vector<8x1xf32>
    %111 = vector.broadcast %110 : vector<8x1xf32> to vector<8x32xf32>
    %112 = arith.mulf %107, %111 : vector<8x32xf32>
    %113 = vector.broadcast %93 : vector<1x32xf32> to vector<8x32xf32>
    %114 = arith.mulf %112, %113 : vector<8x32xf32>
    %115 = vector.broadcast %94 : vector<1x32xf32> to vector<8x32xf32>
    %116 = arith.addf %114, %115 : vector<8x32xf32>
    %117 = arith.truncf %116 : vector<8x32xf32> to vector<8x32xbf16>
    %c0_51 = arith.constant 0 : index
    %c0_52 = arith.constant 0 : index
    %118 = vector.load %arg15[%c0_51, %c0_52] : memref<32x128xbf16, #tpu.memory_space<vmem>>, vector<32x128xbf16>
    %cst_53 = arith.constant dense<0.000000e+00> : vector<8x128xf32>
    %119 = tpu.matmul %117, %118, %cst_53 {dimension_numbers = #tpu.dot_dimension_numbers<[1], [0], [0], [1], [0, 0, 1, 1], [], []>} : vector<8x32xbf16>, vector<32x128xbf16>, vector<8x128xf32> -> vector<8x128xf32>
    %c0_54 = arith.constant 0 : index
    %c0_55 = arith.constant 0 : index
    %120 = vector.load %arg16[%c0_54, %c0_55] : memref<1x128xf32, #tpu.memory_space<vmem>>, vector<1x128xf32>
    %121 = vector.broadcast %120 : vector<1x128xf32> to vector<8x128xf32>
    %122 = arith.addf %119, %121 : vector<8x128xf32>
    %123 = vector.shape_cast %122 : vector<8x128xf32> to vector<1x8x128xf32>
    %c0_56 = arith.constant 0 : index
    %c0_57 = arith.constant 0 : index
    %c0_58 = arith.constant 0 : index
    %124 = vector.load %arg17[%c0_56, %c0_57, %c0_58] : memref<1x8x128xf32, #tpu.memory_space<vmem>>, vector<1x8x128xf32>
    tpu.vector_store %arg17[%c0_56, %c0_57, %c0_58], %123 {strides = array<i32>} : memref<1x8x128xf32, #tpu.memory_space<vmem>>, vector<1x8x128xf32>,
    return
  }
  func.func @transform_0(%arg0: i32) -> (i32, i32, i32) {
    %c0_i32 = arith.constant 0 : i32
    %c0_i32_0 = arith.constant 0 : i32
    %c0_i32_1 = arith.constant 0 : i32
    return %arg0, %c0_i32, %c0_i32_0 : i32, i32, i32
  }
  func.func @transform_1(%arg0: i32) -> (i32, i32, i32) {
    %c0_i32 = arith.constant 0 : i32
    %c0_i32_0 = arith.constant 0 : i32
    %c0_i32_1 = arith.constant 0 : i32
    return %arg0, %c0_i32, %c0_i32_0 : i32, i32, i32
  }
  func.func @transform_2(%arg0: i32) -> (i32, i32) {
    %c0_i32 = arith.constant 0 : i32
    %c0_i32_0 = arith.constant 0 : i32
    %c0_i32_1 = arith.constant 0 : i32
    return %c0_i32, %c0_i32_0 : i32, i32
  }
  func.func @transform_3(%arg0: i32) -> (i32, i32) {
    %c0_i32 = arith.constant 0 : i32
    %c0_i32_0 = arith.constant 0 : i32
    %c0_i32_1 = arith.constant 0 : i32
    return %c0_i32, %c0_i32_0 : i32, i32
  }
  func.func @transform_4(%arg0: i32) -> (i32, i32) {
    %c0_i32 = arith.constant 0 : i32
    %c0_i32_0 = arith.constant 0 : i32
    %c0_i32_1 = arith.constant 0 : i32
    return %c0_i32, %c0_i32_0 : i32, i32
  }
  func.func @transform_5(%arg0: i32) -> (i32, i32) {
    %c0_i32 = arith.constant 0 : i32
    %c0_i32_0 = arith.constant 0 : i32
    %c0_i32_1 = arith.constant 0 : i32
    return %c0_i32, %c0_i32_0 : i32, i32
  }
  func.func @transform_6(%arg0: i32) -> (i32, i32) {
    %c0_i32 = arith.constant 0 : i32
    %c0_i32_0 = arith.constant 0 : i32
    %c0_i32_1 = arith.constant 0 : i32
    return %c0_i32, %c0_i32_0 : i32, i32
  }
  func.func @transform_7(%arg0: i32) -> (i32, i32) {
    %c0_i32 = arith.constant 0 : i32
    %c0_i32_0 = arith.constant 0 : i32
    %c0_i32_1 = arith.constant 0 : i32
    return %c0_i32, %c0_i32_0 : i32, i32
  }
  func.func @transform_8(%arg0: i32) -> (i32, i32) {
    %c0_i32 = arith.constant 0 : i32
    %c0_i32_0 = arith.constant 0 : i32
    %c0_i32_1 = arith.constant 0 : i32
    return %c0_i32, %c0_i32_0 : i32, i32
  }
  func.func @transform_9(%arg0: i32) -> (i32, i32) {
    %c0_i32 = arith.constant 0 : i32
    %c0_i32_0 = arith.constant 0 : i32
    %c0_i32_1 = arith.constant 0 : i32
    return %c0_i32, %c0_i32_0 : i32, i32
  }
  func.func @transform_10(%arg0: i32) -> (i32, i32) {
    %c0_i32 = arith.constant 0 : i32
    %c0_i32_0 = arith.constant 0 : i32
    %c0_i32_1 = arith.constant 0 : i32
    return %c0_i32, %c0_i32_0 : i32, i32
  }
  func.func @transform_11(%arg0: i32) -> (i32, i32) {
    %c0_i32 = arith.constant 0 : i32
    %c0_i32_0 = arith.constant 0 : i32
    %c0_i32_1 = arith.constant 0 : i32
    return %c0_i32, %c0_i32_0 : i32, i32
  }
  func.func @transform_12(%arg0: i32) -> (i32, i32) {
    %c0_i32 = arith.constant 0 : i32
    %c0_i32_0 = arith.constant 0 : i32
    %c0_i32_1 = arith.constant 0 : i32
    return %c0_i32, %c0_i32_0 : i32, i32
  }
  func.func @transform_13(%arg0: i32) -> (i32, i32) {
    %c0_i32 = arith.constant 0 : i32
    %c0_i32_0 = arith.constant 0 : i32
    %c0_i32_1 = arith.constant 0 : i32
    return %c0_i32, %c0_i32_0 : i32, i32
  }
  func.func @transform_14(%arg0: i32) -> (i32, i32) {
    %c0_i32 = arith.constant 0 : i32
    %c0_i32_0 = arith.constant 0 : i32
    %c0_i32_1 = arith.constant 0 : i32
    return %c0_i32, %c0_i32_0 : i32, i32
  }
  func.func @transform_15(%arg0: i32) -> (i32, i32) {
    %c0_i32 = arith.constant 0 : i32
    %c0_i32_0 = arith.constant 0 : i32
    %c0_i32_1 = arith.constant 0 : i32
    return %c0_i32, %c0_i32_0 : i32, i32
  }
  func.func @transform_16(%arg0: i32) -> (i32, i32, i32) {
    %c0_i32 = arith.constant 0 : i32
    %c0_i32_0 = arith.constant 0 : i32
    %c0_i32_1 = arith.constant 0 : i32
    return %arg0, %c0_i32, %c0_i32_0 : i32, i32, i32
  }
}

</mosaic_0001>

<bundles_post_ra>
// kernel: tpu_custom_call.1
= control target key start
LH: loop header
LB: loop body
LE: loop exit
PB: predicated region body
PF: predicated region fallthrough
CT: control target
= control target key end

     0   :  { %s1887_s0 = inlined_call_operand.vmem [shape: bf16[2,8,32], index: 0, kind: input, shape index: {}]   ;;  %s1888_s1 = inlined_call_operand.vmem [shape: f32[2,1,8], index: 1, kind: input, shape index: {}]   ;;  %s1889_s2 = inlined_call_operand.vmem [shape: bf16[32,384], index: 2, kind: input, shape index: {}]   ;;  %s1890_s3 = inlined_call_operand.vmem [shape: f32[1,384], index: 3, kind: input, shape index: {}]   ;;  %s1891_s4 = inlined_call_operand.vmem [shape: bf16[128,32], index: 4, kind: input, shape index: {}]   ;;  %s1892_s5 = inlined_call_operand.vmem [shape: f32[1,32], index: 5, kind: input, shape index: {}]   ;;  %s1893_s6 = inlined_call_operand.vmem [shape: f32[1,32], index: 6, kind: input, shape index: {}]   ;;  %s1894_s7 = inlined_call_operand.vmem [shape: f32[1,32], index: 7, kind: input, shape index: {}]   ;;  %s1895_s8 = inlined_call_operand.vmem [shape: bf16[32,64], index: 8, kind: input, shape index: {}]   ;;  %s1896_s9 = inlined_call_operand.vmem [shape: f32[1,64], index: 9, kind: input, shape index: {}]   ;;  %s1897_s10 = inlined_call_operand.vmem [shape: bf16[64,32], index: 10, kind: input, shape index: {}]   ;;  %s1898_s11 = inlined_call_operand.vmem [shape: f32[1,32], index: 11, kind: input, shape index: {}]   ;;  %s1899_s12 = inlined_call_operand.vmem [shape: f32[1,32], index: 12, kind: input, shape index: {}]   ;;  %s1900_s13 = inlined_call_operand.vmem [shape: f32[1,32], index: 13, kind: input, shape index: {}]   ;;  %s1901_s14 = inlined_call_operand.vmem [shape: bf16[32,128], index: 14, kind: input, shape index: {}]   ;;  %s1902_s15 = inlined_call_operand.vmem [shape: f32[1,128], index: 15, kind: input, shape index: {}]   ;;  %s1903_s16 = inlined_call_operand.hbm [shape: f32[2,8,128], index: 16, kind: output, shape index: {}]  }
   0x1   :  { %1908 = sst [smem:[#allocation9_spill]] %s1887_s0 }
   0x2   :  { %1909 = sst [smem:[#allocation10_spill]] %s1888_s1 }
   0x3   :  { %21 = vsyncpa [#allocation3], 0 }
   0x4   :  { %23 = vsyncpa [#allocation3 + $0x1], 0  ;;  %s1638_s21 = smov 0   ;;  %s1640_s22 = smov 0  }
   0x5   :  { %s1642_s23 = smov 0   ;;  %s1644_s24 = smov 0  }
   0x6 LB: > { %1910 = sst [smem:[#allocation5_spill]] %s1543_s23  ;;  %s1659_s25 = sadd.s32 4294967295, %s1547_s24   ;;  %s1547_s24 = sphi %s1644_s24, %s1919_s24   ;;  %s1543_s23 = sphi %s1642_s23, %s1921_s23   ;;  %s1539_s22 = sphi %s1640_s22, %s1923_s22   ;;  %s1535_s21 = sphi %s1638_s21, %s1922_s21  }
   0x7   : > { %s1269_s26 = sadd.s32 4294967294, %s1547_s24   ;;  %s1663_s27 = sadd.s32 1, %s1547_s24  }
   0x8   : > { %1911 = sst [smem:[#allocation6_spill]] %s1663_s27  ;;  %s382_s28 = sadd.s32 1, %s1543_s23 }
   0x9   : > { %s379_s29 = ssub.s32 %s1547_s24, %s1663_s27  ;;  %p392_p0 = scmp.ne.s32.totalorder %s1543_s23, %s1539_s22 }
   0xa   : > { %p380_p1 = scmp.eq.s32.totalorder %s379_s29, 0  ;;  %p393_p2 = scmp.eq.s32.totalorder %s1659_s25, 1 }
   0xb   : > { %p398_p3 = scmp.ne.s32.totalorder %s1539_s22, %s1535_s21  ;;  %p399_p4 = scmp.eq.s32.totalorder %s1269_s26, 1 }
   0xc   : > { %s1674_s30 = scalar_select %p380_p1, %s1543_s23, %s382_s28  }
   0xd   : > { %p1676_p5 = por %p393_p2, %p392_p0  ;;  %p1680_p6 = por %p399_p4, %p398_p3 }
   0xe   : > { %1912 = sst [smem:[#allocation7_spill]] %s1674_s30  ;;  %p1272_p7 = scmp.ge.s32.totalorder %s1547_s24, 1 }
   0xf   : > { %s1914_s17 = scalar_select %p1680_p6, 1, 0 }
  0x10   : > { %p472_p8 = scmp.lt.s32.totalorder %s1547_s24, 3 }
  0x11   : > { %1915 = sst [smem:[#allocation8_spill]] %s1914_s17 }
  0x12   : > { %p473_p9 = pnand %p1272_p7, %p472_p8 }
  0x13   : > { %p524_p10 = scmp.lt.s32.totalorder (!%p473_p9), %s1659_s25, 1  ;;  %s1916_s27 = sld [smem:[#allocation9_spill]] (!%p473_p9) }
  0x14   : > { %476 = sbr.rel (%p473_p9) target bundleno = 2394 (0x95a), region = 84  ;;  %s1917_s1 = sld [smem:[#allocation10_spill]] (!%p473_p9) }
  0x15   : > { %s521_s18 = sand.u32 (!%p473_p9), 1, %s1539_s22  }
  0x16   : > { %s1273_s19 = sshll.u32 (!%p473_p9), %s521_s18, 3  ;;  %s1188_s20 = scalar_lea.sflag (!%p473_p9), [#allocation3], %s521_s18 }
  0x19   : > { %v1453_v0 = vld [vmem:[%s1889_s2 + $0x1c] ss:$12 sps:$4 sm:$0xff]   ;;  %v1455_v1 = vld [vmem:[%s1889_s2 + $0x18] ss:$12 sps:$4 sm:$0xff]   ;;  %v1549_v2 = vmov 0   ;;  %s1697_s30 = scalar_select %p524_p10, %s1659_s25, 1  ;;  %v543_v7 = vlaneseq }
  0x1a   : > { %626 = vmatprep.mubr.bf16.mxu0 %v1549_v2  ;;  %606 = vmatprep.subr.bf16.mxu0 %v1453_v0  ;;  %v1456_v3 = vld [vmem:[%s1889_s2 + $0x4] ss:$12 sps:$4 sm:$0xff]   ;;  %v1458_v4 = vld [vmem:[%s1889_s2] ss:$12 sps:$4 sm:$0xff]   ;;  %vm590_vm0 = vcmask 261120   ;;  %v1550_v6 = vmov 0.0  }
  0x1b   : > { %607 = vmatpush1.bf16.msra.mxu0 %v1455_v1  ;;  %s1274_s23 = sshll.u32 %s1697_s30, 2  ;;  %1343 = vmatprep.subr.bf16.mxu1 %v1550_v6  ;;  %vm1551_vm1 = vmmov 0   ;;  %v544_v8 = vshrl.u32 %v543_v7, 7  ;;  %v541_v10 = vld [vmem:[%s1890_s3] sm:$0x7]  ;;  %s530_s26 = scalar_lea.vmem %s1917_s1, %s1697_s30  ;;  %vm725_vm2 = vcmask 64512  }
  0x1c   : > { %608 = vmatprep.subr.bf16.mxu0 %v1456_v3  ;;  %s527_s17 = scalar_lea.vmem %s1916_s27, %s1274_s23  ;;  %1347 = vmatprep.mubr.msk.bf16.mxu1 %vm1551_vm1, %v1550_v6  ;;  %v1459_v22 = vld [vmem:[%s1889_s2 + $0x20] ss:$12 sps:$4 sm:$0xff]   ;;  %v1460_v23 = vld [vmem:[%s1889_s2 + $0x8] ss:$12 sps:$4 sm:$0xff]   ;;  %vm741_vm3 = vcmask 1043456   ;;  %v1461_v45 = vld [vmem:[%s1891_s4 + $0x38] sm:$0xff]  }
  0x1d   : > { %v1706_v5 = vld [vmem:[%s527_s17] sm:$0xf]  ;;  %v549_v9 = vsub.s32 1, %v544_v8  ;;  %v545_v12 = vsub.s32 0, %v544_v8  ;;  %1344 = vmatpush3.bf16.msra.mxu1 %v1459_v22  ;;  %v553_v31 = vsub.s32 2, %v544_v8  ;;  %v1462_v46 = vld [vmem:[%s1891_s4 + $0x30] sm:$0xff]  }
  0x1e   : > { %1345 = vmatprep.subr.bf16.mxu1 %v1550_v6  ;;  %v1283_v24 = vld [vmem:[%s530_s26] ss:$0 sm:$0xff]  ;;  %v1463_v47 = vld [vmem:[%s1891_s4 + $0x28] sm:$0xff]   ;;  %v1465_v49 = vld [vmem:[%s1891_s4 + $0x18] sm:$0xff]   ;;  %v897_v63 = vunpack.c.l.bf16 %v1706_v5  ;;  %vm1045_vm4 = vcmask 523264   ;;  %s1313_s30 = sshll.u32 %s1659_s25, 7 }
  0x1f   : > { %609 = vmatpush1.bf16.msra.mxu0 %v1458_v4  ;;  %v550_v11 = vrot.slane %v541_v10, %v549_v9  ;;  %v546_v16 = vrot.slane %v541_v10, %v545_v12  ;;  %v554_v32 = vrot.slane %v541_v10, %v553_v31  ;;  %v1464_v48 = vld [vmem:[%s1891_s4 + $0x20] sm:$0xff]   ;;  %v1466_v50 = vld [vmem:[%s1891_s4 + $0x10] sm:$0xff]   ;;  %v1467_v51 = vld [vmem:[%s1891_s4 + $0x8] sm:$0xff]   ;;  %s523_s23 = scalar_lea.vmem [#allocation2], %s1273_s19  ;;  %s1846_s29 = scalar_lea.hbm %s1903_s16, %s1313_s30 }
  0x20   : > { %1351 = vmatprep.subr.bf16.mxu0 %v1550_v6  ;;  %v1468_v56 = vld [vmem:[%s1891_s4] sm:$0xff]   ;;  %s1201_s27 = sshll.u32 %s523_s23, 4  ;;  %s1552_s25 = smov [#allocation2]   ;;  %s1848_s27 = int_to_ptr.vmem [resolvable:$true] %s1201_s27 }
  0x21   : > { %1346 = vmatpush3.bf16.msra.mxu1 %v1460_v23  ;;  %v1285_v62 = vld [vmem:[%s1892_s5] ss:$0 sm:$0xff]  ;;  %s1487_s26 = scalar_lea.vmem %s1848_s27, 128  ;;  %s1491_s19 = sshll.u32 %s1552_s25, 4  ;;  %s1492_s19 = int_to_ptr.vmem [resolvable:$false] %s1491_s19 }
  0x22   : > { %1281 = vmatmul.mubr.msk.bf16.vlgmr.msra.gmra.mxu0 %vm590_vm0, %v1706_v5  ;;  %1357 = vmatprep.subr.bf16.mxu1 %v1550_v6  ;;  %p1488_p11 = scmp.ne.s32.totalorder %s1848_s27, %s1487_s26  ;;  %s1493_s17 = scalar_lea.vmem %s1492_s19, 256 }
  0x23   : > { %1353 = vmatprep.mubr.msk.bf16.mxu0 %vm1551_vm1, %v1550_v6  ;;  %p1494_p0 = scmp.lt.s32.totalorder %s1848_s27, %s1492_s19  ;;  %p1495_p1 = scmp.lt.s32.totalorder %s1493_s17, %s1487_s26 }
  0x24   : > { %1348 = vmatmul.mubr.msk.bf16.vlgmr.msra.gmra.mxu1 %vm590_vm0, %v1706_v5  ;;  %v1469_v5 = vld [vmem:[%s1895_s8 + $0x8] sm:$0xff]   ;;  %p1489_p12 = pnand %p1488_p11, %p1676_p5 }
  0x25   : > { %1359 = vmatprep.mubr.msk.bf16.mxu1 %vm1551_vm1, %v1550_v6  ;;  %p1496_p2 = por %p1495_p1, %p1494_p0 }
  0x26   : > { %p1490_p13 = pneg %p1489_p12 }
  0x28   : > { %p1497_p3 = pnand %p1496_p2, %p1490_p13 }
  0xe2   : > { %v628_v13 = vpop.f32.mrf.mxu0 }
  0xe3   : > { %v629_v20 = vadd.f32 %v628_v13, %v546_v16 }
  0xe4   : > { %v630_v14 = vpop.f32.mrf.mxu0  ;;  %v669_v33 = vpop.f32.mrf.mxu1 }
  0xe5   : > { %v631_v15 = vadd.f32 %v630_v14, %v550_v11  ;;  %v675_v21 = vpack.c.bf16 %v629_v20, %v629_v20  ;;  %v670_v34 = vadd.f32 %v669_v33, %v554_v32  ;;  %v1470_v14 = vld [vmem:[%s1895_s8] sm:$0xff]  }
  0xe6   : > { %v632_v17 = vpop.f32.mrf.mxu0  ;;  %v1349_v35 = vpop.f32.mrf.mxu1 }
  0xe7   : > { %v676_v18 = vpack.c.bf16 %v631_v15, %v631_v15  ;;  %v677_v36 = vpack.c.bf16 %v670_v34, %v670_v34 }
  0xe8   : > { %v633_v19 = vpop.f32.mrf.mxu0  ;;  %v672_v37 = vpop.f32.mrf.mxu1 }
  0xe9   : > { %1352 = vmatpush3.bf16.xpose.msra.mxu0 %v676_v18  ;;  %v743_v38 = vsel %vm741_vm3, %v677_v36, 0  ;;  %v1294_v19 = vld [vmem:[%s1893_s6] ss:$0 sm:$0xff] }
  0xea   : > { %1363 = vmatprep.subr.bf16.mxu0 %v1550_v6  ;;  %v1350_v39 = vpop.f32.mrf.mxu1  ;;  %1358 = vmatpush3.bf16.msra.mxu1 %v743_v38 }
  0xeb   : > { %1383 = vmatprep.subr.bf16.mxu1 %v1550_v6 }
  0xf0   : > { %1354 = vmatmul.mubr.bf16.vlgmr.msra.gmra.mxu0 %v675_v21  ;;  %v1295_v21 = vld [vmem:[%s1894_s7] ss:$0 sm:$0xff] }
  0xf1   : > { %1379 = vmatprep.mubr.msk.bf16.mxu0 %vm1551_vm1, %v1550_v6  ;;  %1364 = vmatpush3.bf16.msra.mxu0 %v1461_v45  ;;  %v1300_v45 = vld [vmem:[%s1898_s11] ss:$0 sm:$0xff] }
  0xf2   : > { %1365 = vmatprep.subr.bf16.mxu0 %v1550_v6 }
  0xf5   : > { %1366 = vmatpush3.bf16.msra.mxu0 %v1462_v46 }
  0xf6   : > { %1367 = vmatprep.subr.bf16.mxu0 %v1550_v6 }
  0xf9   : > { %1368 = vmatpush3.bf16.msra.mxu0 %v1463_v47 }
  0xfa   : > { %1369 = vmatprep.subr.bf16.mxu0 %v1550_v6 }
  0xfd   : > { %1370 = vmatpush3.bf16.msra.mxu0 %v1464_v48 }
  0xfe   : > { %1371 = vmatprep.subr.bf16.mxu0 %v1550_v6 }
 0x101   : > { %1372 = vmatpush3.bf16.msra.mxu0 %v1465_v49 }
 0x102   : > { %1373 = vmatprep.subr.bf16.mxu0 %v1550_v6 }
 0x105   : > { %1374 = vmatpush3.bf16.msra.mxu0 %v1466_v50 }
 0x106   : > { %1375 = vmatprep.subr.bf16.mxu0 %v1550_v6 }
 0x109   : > { %1376 = vmatpush3.bf16.msra.mxu0 %v1467_v51 }
 0x10a   : > { %1377 = vmatprep.subr.bf16.mxu0 %v1550_v6 }
 0x10d   : > { %1378 = vmatpush3.bf16.msra.mxu0 %v1468_v56 }
 0x1b0   : > { %v719_v25 = vpop.f32.mrf.mxu0 }
 0x1b1   : > { %v720_v26 = vadd.f32 %v1283_v24, %v719_v25  ;;  %v1471_v25 = vld [vmem:[%s1897_s10 + $0x18] sm:$0xff]  }
 0x1b2   : > { %v1355_v27 = vpop.f32.mrf.mxu0 }
 0x1b3   : > { %v726_v28 = vsel %vm725_vm2, %v720_v26, -inf  ;;  %v1473_v27 = vld [vmem:[%s1897_s10 + $0x8] sm:$0xff]  }
 0x1b4   : > { %727 = vmax.xlane.f32.xlu0 %v726_v28  ;;  %v722_v29 = vpop.f32.mrf.mxu0  ;;  %v1474_v28 = vld [vmem:[%s1897_s10] sm:$0xff]  }
 0x1b5   : > { %v1296_v29 = vld [vmem:[%s1896_s9] ss:$0 sm:$0xff] }
 0x1b6   : > { %v1356_v30 = vpop.f32.mrf.mxu0 }
 0x23d   : > { %v728_v40 = vpop.xlane.xlu0 %727 }
 0x23e   : > { %v729_v41 = vsub.f32 %v720_v26, %v728_v40  ;;  %v1472_v26 = vld [vmem:[%s1897_s10 + $0x10] sm:$0xff]  }
 0x240   : > { %v730_v42 = vmul.f32 1.442695, %v729_v41 }
 0x242   : > { %1477 = vpow2.f32 %v730_v42 }
 0x24f   : > { %v1478_v43 = vpop.eup %1477 }
 0x250   : > { %v732_v44 = vsel %vm725_vm2, %v1478_v43, 0.0 }
 0x251   : > { %733 = vadd.xlane.f32.xlu0 %v732_v44 }
 0x2da   : > { %v734_v52 = vpop.xlane.xlu0 %733 }
 0x2db   : > { %1479 = vrcp.f32 %v734_v52 }
 0x2e8   : > { %v1480_v53 = vpop.eup %1479 }
 0x2e9   : > { %v736_v54 = vmul.f32 %v1480_v53, %v1478_v43 }
 0x2eb   : > { %v737_v55 = vpack.c.bf16 %v736_v54, %v736_v54 }
 0x2ed   : > { %1360 = vmatmul.mubr.msk.bf16.vlgmr.msra.gmra.mxu1 %vm725_vm2, %v737_v55 }
 0x2ee   : > { %1387 = vmatprep.mubr.msk.bf16.mxu1 %vm1551_vm1, %v1550_v6  ;;  %1384 = vmatpush3.bf16.msra.mxu1 %v1469_v5 }
 0x2ef   : > { %1385 = vmatprep.subr.bf16.mxu1 %v1550_v6 }
 0x2f2   : > { %1386 = vmatpush3.bf16.msra.mxu1 %v1470_v14 }
 0x2f3   : > { %1391 = vmatprep.subr.bf16.mxu1 %v1550_v6 }
 0x3ad   : > { %v779_v57 = vpop.f32.mrf.mxu1 }
 0x3ae   : > { %v785_v58 = vpack.c.bf16 %v779_v57, %v779_v57 }
 0x3af   : > { %v1361_v59 = vpop.f32.mrf.mxu1 }
 0x3b0   : > { %1380 = vmatmul.mubr.bf16.vlgmr.msra.gmra.mxu0 %v785_v58  ;;  %v1475_v58 = vld [vmem:[%s1901_s14 + $0x8] sm:$0xff]   ;;  %v1476_v59 = vld [vmem:[%s1901_s14] sm:$0xff]  }
 0x3b1   : > { %v782_v60 = vpop.f32.mrf.mxu1 }
 0x3b3   : > { %v1362_v61 = vpop.f32.mrf.mxu1 }
 0x470   : > { %v891_v0 = vpop.f32.mrf.mxu0 }
 0x471   : > { %v892_v1 = vadd.f32 %v1285_v62, %v891_v0  ;;  %v1306_v0 = vld [vmem:[%s1899_s12] ss:$0 sm:$0xff] }
 0x472   : > { %v1381_v2 = vpop.f32.mrf.mxu0 }
 0x473   : > { %v898_v3 = vadd.f32 %v897_v63, %v892_v1  ;;  %v1307_v2 = vld [vmem:[%s1900_s13] ss:$0 sm:$0xff] }
 0x474   : > { %v894_v4 = vpop.f32.mrf.mxu0 }
 0x475   : > { %v901_v7 = vsel %vm590_vm0, %v898_v3, 0.0 }
 0x476   : > { %902 = vadd.xlane.f32.xlu1 %v901_v7  ;;  %v1382_v8 = vpop.f32.mrf.mxu0 }
 0x4ff   : > { %v903_v9 = vpop.xlane.xlu1 %902 }
 0x500   : > { %v905_v10 = vmul.f32 0.03125, %v903_v9 }
 0x502   : > { %v906_v11 = vsub.f32 %v898_v3, %v905_v10 }
 0x504   : > { %v907_v12 = vmul.f32 %v906_v11, %v906_v11 }
 0x506   : > { %v908_v13 = vsel %vm590_vm0, %v907_v12, 0.0 }
 0x507   : > { %909 = vadd.xlane.f32.xlu1 %v908_v13 }
 0x590   : > { %v910_v15 = vpop.xlane.xlu1 %909 }
 0x591   : > { %v911_v16 = vmul.f32 0.03125, %v910_v15 }
 0x593   : > { %v912_v17 = vadd.f32 1e-12, %v911_v16 }
 0x595   : > { %1481 = vrsqrt.f32 %v912_v17 }
 0x5a2   : > { %v1482_v18 = vpop.eup %1481 }
 0x5a3   : > { %v914_v20 = vmul.f32 %v1482_v18, %v906_v11 }
 0x5a5   : > { %v921_v22 = vmul.f32 %v1294_v19, %v914_v20 }
 0x5a7   : > { %v928_v23 = vadd.f32 %v1295_v21, %v921_v22 }
 0x5a9   : > { %v929_v24 = vpack.c.bf16 %v928_v23, %v928_v23 }
 0x5ab   : > { %1388 = vmatmul.mubr.msk.bf16.vlgmr.msra.gmra.mxu1 %vm590_vm0, %v929_v24 }
 0x5ac   : > { %1399 = vmatprep.mubr.msk.bf16.mxu1 %vm1551_vm1, %v1550_v6  ;;  %1392 = vmatpush3.bf16.msra.mxu1 %v1471_v25 }
 0x5ad   : > { %1393 = vmatprep.subr.bf16.mxu1 %v1550_v6 }
 0x5b0   : > { %1394 = vmatpush3.bf16.msra.mxu1 %v1472_v26 }
 0x5b1   : > { %1395 = vmatprep.subr.bf16.mxu1 %v1550_v6 }
 0x5b4   : > { %1396 = vmatpush3.bf16.msra.mxu1 %v1473_v27 }
 0x5b5   : > { %1397 = vmatprep.subr.bf16.mxu1 %v1550_v6 }
 0x5b8   : > { %1398 = vmatpush3.bf16.msra.mxu1 %v1474_v28 }
 0x5b9   : > { %1403 = vmatprep.subr.bf16.mxu1 %v1550_v6 }
 0x66b   : > { %v990_v30 = vpop.f32.mrf.mxu1 }
 0x66c   : > { %v991_v31 = vadd.f32 %v1296_v29, %v990_v30 }
 0x66d   : > { %v1389_v32 = vpop.f32.mrf.mxu1 }
 0x66e   : > { %v996_v33 = vmul.f32 %v991_v31, %v991_v31 }
 0x66f   : > { %v993_v34 = vpop.f32.mrf.mxu1 }
 0x670   : > { %v997_v35 = vmul.f32 %v996_v33, %v991_v31 }
 0x671   : > { %v1390_v36 = vpop.f32.mrf.mxu1 }
 0x672   : > { %v998_v37 = vmul.f32 0.044715, %v997_v35 }
 0x674   : > { %v999_v38 = vadd.f32 %v998_v37, %v991_v31 }
 0x676   : > { %v1000_v39 = vmul.f32 0.7978846, %v999_v38 }
 0x678   : > { %1483 = vtanh.f32 %v1000_v39 }
 0x685   : > { %v1484_v40 = vpop.eup %1483 }
 0x686   : > { %v1002_v41 = vadd.f32 1.0, %v1484_v40 }
 0x688   : > { %v1003_v42 = vmul.f32 0.5, %v1002_v41 }
 0x68a   : > { %v1004_v43 = vmul.f32 %v1003_v42, %v991_v31 }
 0x68c   : > { %v1005_v44 = vpack.c.bf16 %v1004_v43, %v1004_v43 }
 0x68e   : > { %1400 = vmatmul.mubr.msk.bf16.vlgmr.msra.gmra.mxu1 %vm1045_vm4, %v1005_v44 }
 0x68f   : > { %1407 = vmatprep.mubr.msk.bf16.mxu1 %vm1551_vm1, %v1550_v6  ;;  %1404 = vmatpush3.bf16.msra.mxu1 %v1475_v58 }
 0x690   : > { %1405 = vmatprep.subr.bf16.mxu1 %v1550_v6  ;;  %v1308_v6 = vld [vmem:[%s1902_s15] ss:$0 sm:$0xff] }
 0x693   : > { %1406 = vmatpush3.bf16.msra.mxu1 %v1476_v59 }
 0x74e   : > { %v1083_v46 = vpop.f32.mrf.mxu1 }
 0x74f   : > { %v1084_v47 = vadd.f32 %v1300_v45, %v1083_v46 }
 0x750   : > { %v1401_v48 = vpop.f32.mrf.mxu1 }
 0x751   : > { %v1089_v49 = vadd.f32 %v1084_v47, %v928_v23 }
 0x752   : > { %v1086_v50 = vpop.f32.mrf.mxu1 }
 0x753   : > { %v1092_v51 = vsel %vm590_vm0, %v1089_v49, 0.0 }
 0x754   : > { %1093 = vadd.xlane.f32.xlu0 %v1092_v51  ;;  %v1402_v52 = vpop.f32.mrf.mxu1 }
 0x7dd   : > { %v1094_v53 = vpop.xlane.xlu0 %1093 }
 0x7de   : > { %v1095_v54 = vmul.f32 0.03125, %v1094_v53 }
 0x7e0   : > { %v1096_v55 = vsub.f32 %v1089_v49, %v1095_v54 }
 0x7e2   : > { %v1097_v56 = vmul.f32 %v1096_v55, %v1096_v55 }
 0x7e4   : > { %v1098_v57 = vsel %vm590_vm0, %v1097_v56, 0.0 }
 0x7e5   : > { %1099 = vadd.xlane.f32.xlu1 %v1098_v57 }
 0x86e   : > { %v1100_v60 = vpop.xlane.xlu1 %1099 }
 0x86f   : > { %v1101_v61 = vmul.f32 0.03125, %v1100_v60 }
 0x871   : > { %v1102_v62 = vadd.f32 1e-12, %v1101_v61 }
 0x873   : > { %1485 = vrsqrt.f32 %v1102_v62 }
 0x880   : > { %v1486_v63 = vpop.eup %1485 }
 0x881   : > { %v1104_v1 = vmul.f32 %v1486_v63, %v1096_v55 }
 0x883   : > { %v1111_v3 = vmul.f32 %v1306_v0, %v1104_v1 }
 0x885   : > { %v1118_v4 = vadd.f32 %v1307_v2, %v1111_v3 }
 0x887   : > { %v1119_v7 = vpack.c.bf16 %v1118_v4, %v1118_v4 }
 0x889   : > { %1408 = vmatmul.mubr.msk.bf16.vlgmr.msra.gmra.mxu1 %vm590_vm0, %v1119_v7 }
 0x949   : > { %v1180_v8 = vpop.f32.mrf.mxu1 }
 0x94a   : > { %v1181_v9 = vadd.f32 %v1308_v6, %v1180_v8 }
 0x94b   : > { %v1409_v10 = vpop.f32.mrf.mxu1 }
 0x94c   : > { %1186 = vst [vmem:[%s523_s23] sm:$0xff] %v1181_v9 }
 0x94d   : > { %v1183_v11 = vpop.f32.mrf.mxu1 }
 0x94e   : > { %1500 = shalt.err (!%p1497_p3)
}
 0x94f   : > { %s1501_s30 = scalar_lea.hbm %s1846_s29, 128  ;;  %s1505_s28 = scalar_lea.hbm %s1903_s16, 256 }
 0x950   : > { %p1502_p4 = scmp.ne.s32.totalorder %s1846_s29, %s1501_s30  ;;  %p1506_p9 = scmp.lt.s32.totalorder %s1846_s29, %s1903_s16 }
 0x951   : > { %p1507_p10 = scmp.lt.s32.totalorder %s1505_s28, %s1501_s30 }
 0x952   : > { %p1503_p7 = pnand %p1502_p4, %p1676_p5 }
 0x953   : > { %p1508_p11 = por %p1507_p10, %p1506_p9 }
 0x954   : > { %p1504_p8 = pneg %p1503_p7 }
 0x956   : > { %p1509_p12 = pnand %p1508_p11, %p1504_p8 }
 0x958   : > { %1512 = shalt.err (!%p1509_p12)
}
 0x959   : > { %1411 = dma.vmem_to_hbm [thread:$0]  (%p1676_p5), %s1848_s27, 128, %s1846_s29, %s1188_s20   ;;  %v1410_v12 = vpop.f32.mrf.mxu1 }
 0x95a PF: > { %p1417_p13 = scmp.ge.s32.totalorder %s1547_s24, 2  ;;  %s1213_s19 = sand.u32 1, %s1535_s21  }
 0x95b   : > { %s1214_s1 = scalar_lea.sflag [#allocation3], %s1213_s19 }
 0x95c   : > { %p1414_p0 = pnand %p1417_p13, %p1680_p6 }
 0x95e   : > { %p1415_p1 = pneg %p1414_p0 }
 0x960   : > { %1530 = dma.done.wait (%p1415_p1), %s1214_s1, 128  }
 0x961   : > { %1532 = vsyncadd (%p1415_p1), %s1214_s1, 4294967168  ;;  %s1919_s24 = sld [smem:[#allocation6_spill]]  ;;  %s1922_s21 = smov %s1539_s22 }
 0x962   : > { %s1920_s17 = sld [smem:[#allocation5_spill]] }
 0x963   : > { %s1921_s23 = sld [smem:[#allocation7_spill]] }
 0x967   : > { %p26_p2 = scmp.ge.s32.totalorder %s1919_s24, 4  }
 0x968   : > { %s1923_s22 = smov %s1920_s17 }
 0x969   :  { %28 = sbr.rel (!%p26_p2) target bundleno = 6 (0x6), region = 122 }
 0x96e   :  { %1219 = vsyncpa [#allocation3], 1 }
 0x96f   :  { %1221 = vsyncpa [#allocation3 + $0x1], 1 }

</bundles_post_ra>
